<compile_context>
chip_gen: v7x
topology: tpu7x:2x2x1
jax: 0.10.0
libtpu: 0.0.40
codegen_flags: <defaults>
</compile_context>

<pallas_src>
import functools
import numpy as np
import jax
import jax.numpy as jnp
from jax.experimental import pallas as pl
from jax.experimental.pallas import tpu as pltpu


def _round_up(x: int, m: int) -> int:
    return ((x + m - 1) // m) * m


def _pick_tile(padded_dim: int, target: int, align: int) -> int:
    """Largest multiple of `align` <= target that divides padded_dim."""
    if padded_dim <= target:
        return padded_dim
    best = align
    for t in range(align, target + 1, align):
        if padded_dim % t == 0:
            best = t
    return best


def _vmem_capacity_bytes() -> int:
    try:
        return int(pltpu.get_tpu_info().vmem_capacity_bytes)
    except Exception:
        return 64 << 20  # conservative (v7x per-TC) fallback


# ----------------------------------------------------------------------------
# Deterministic parameter init (replicates BaseLayer._layer_init semantics)
# ----------------------------------------------------------------------------
def layer_init(key, out_features, in_features, bias_const=0.0,
               param_dtype=jnp.bfloat16):
    """kaiming_uniform_(weight) (a=0, fan_in, leaky_relu) + constant_(bias).

    Returns (params, w_f32, b_f32) where params holds the weight pre-transposed
    to (F_in, F_out), zero-padded to lane-aligned (Kp, Np), and cast to
    `param_dtype` ONCE at init time (never in the hot path), plus the bias
    padded to (1, Np) in f32.  w_f32 / b_f32 are the reference-layout params.
    """
    fan_in = in_features
    bound = float(np.sqrt(2.0) * np.sqrt(3.0 / fan_in))   # == sqrt(6 / fan_in)
    w = jax.random.uniform(key, (out_features, in_features), jnp.float32,
                           minval=-bound, maxval=bound)
    b = jnp.full((out_features,), bias_const, jnp.float32)

    Kp = _round_up(in_features, 128)
    Np = _round_up(out_features, 128)
    wt_p = jnp.pad(w.T, ((0, Kp - in_features), (0, Np - out_features)))
    wt_p = wt_p.astype(param_dtype)                        # one-time cast
    b_p = jnp.pad(b, (0, Np - out_features)).reshape(1, Np)  # stays f32

    params = {"wt": wt_p, "b": b_p,
              "in_features": in_features, "out_features": out_features}
    return params, w, b


# ----------------------------------------------------------------------------
# Pallas kernels: tiled y = x @ Wt + b  (Wt already (Kp, Np), zero-padded)
# ----------------------------------------------------------------------------
def _linear_kernel_single(x_ref, wt_ref, b_ref, o_ref):
    # Whole K fits in one block: no accumulator, no branches.
    acc = jnp.dot(x_ref[...], wt_ref[...], preferred_element_type=jnp.float32)
    o_ref[...] = (acc + b_ref[...]).astype(o_ref.dtype)


def _linear_kernel_multi(x_ref, wt_ref, b_ref, o_ref, acc_ref):
    k = pl.program_id(2)
    partial = jnp.dot(x_ref[...], wt_ref[...], preferred_element_type=jnp.float32)

    @pl.when(k == 0)
    def _():                       # assign-on-first-step: no zero-fill store
        acc_ref[...] = partial

    @pl.when(k != 0)
    def _():
        acc_ref[...] += partial

    @pl.when(k == pl.num_programs(2) - 1)
    def _():
        o_ref[...] = (acc_ref[...] + b_ref[...]).astype(o_ref.dtype)


def linear_forward(x, wt_p, b_p, out_features, *,
                   tm_target=None, tn_target=None, tk_target=512):
    """x: (B, F_in); wt_p: (Kp, Np) pre-transposed/padded weight; b_p: (1, Np)."""
    B, F_in = x.shape
    Kp, Np = wt_p.shape
    assert F_in <= Kp and out_features <= Np

    compute_dtype = wt_p.dtype
    out_dtype = x.dtype
    xd = jnp.dtype(compute_dtype).itemsize
    bd = jnp.dtype(b_p.dtype).itemsize
    od = jnp.dtype(out_dtype).itemsize
    sublane = 16 if xd == 2 else 8

    cap = _vmem_capacity_bytes()
    if tm_target is None:
        tm_target = 512
    if tn_target is None:
        # 128 MiB-VMEM parts (v5e/v6e): go wider; 64 MiB (v7x per-TC): 512.
        tn_target = 1024 if cap >= (100 << 20) else 512

    tm = min(tm_target, _round_up(B, sublane))
    tn = _pick_tile(Np, tn_target, 128)
    tk = _pick_tile(Kp, tk_target, 128)

    Bp = _round_up(B, tm)

    # Activation-side prep: one fused cast(+pad) pass.  Weights/bias were
    # padded and cast at init; no pad op at all when shapes are aligned.
    x_p = x.astype(compute_dtype) if x.dtype != compute_dtype else x
    if Bp != B or Kp != F_in:
        x_p = jnp.pad(x_p, ((0, Bp - B), (0, Kp - F_in)))

    gm, gn, gk = Bp // tm, Np // tn, Kp // tk

    if gk == 1:
        kernel = _linear_kernel_single
        grid = (gm, gn)
        in_specs = [
            pl.BlockSpec((tm, tk), lambda i, j: (i, 0)),
            pl.BlockSpec((tk, tn), lambda i, j: (0, j)),
            pl.BlockSpec((1, tn), lambda i, j: (0, j)),
        ]
        out_spec = pl.BlockSpec((tm, tn), lambda i, j: (i, j))
        scratch = []
        dims = ("parallel", "parallel")
        acc_bytes = 0
    else:
        kernel = _linear_kernel_multi
        grid = (gm, gn, gk)
        in_specs = [
            pl.BlockSpec((tm, tk), lambda i, j, k: (i, k)),
            pl.BlockSpec((tk, tn), lambda i, j, k: (k, j)),
            pl.BlockSpec((1, tn), lambda i, j, k: (0, j)),
        ]
        out_spec = pl.BlockSpec((tm, tn), lambda i, j, k: (i, j))
        scratch = [pltpu.VMEM((tm, tn), jnp.float32)]
        dims = ("parallel", "parallel", "arbitrary")
        acc_bytes = tm * tn * 4

    # Actual double-buffered VMEM footprint (+ headroom for Mosaic scratch),
    # clamped to the physical capacity of this generation.
    buf_bytes = 2 * (tm * tk * xd + tk * tn * xd + tn * bd + tm * tn * od) + acc_bytes
    vmem_limit = int(max(32 << 20, min(buf_bytes + (8 << 20), cap)))

    # Bytes accessed including grid re-reads (x re-read per N block, W per M block).
    cost = pl.CostEstimate(
        flops=2 * Bp * Np * Kp,
        transcendentals=0,
        bytes_accessed=(Bp * Kp * xd * gn
                        + Kp * Np * xd * gm
                        + Np * bd * gm
                        + Bp * Np * od),
    )

    out = pl.pallas_call(
        kernel,
        out_shape=jax.ShapeDtypeStruct((Bp, Np), out_dtype),
        grid_spec=pltpu.PrefetchScalarGridSpec(
            num_scalar_prefetch=0,
            grid=grid,
            in_specs=in_specs,
            out_specs=out_spec,
            scratch_shapes=scratch,
        ),
        compiler_params=pltpu.CompilerParams(
            dimension_semantics=dims,
            vmem_limit_bytes=vmem_limit,
        ),
        cost_estimate=cost,
    )(x_p, wt_p, b_p)

    if Bp != B or Np != out_features:
        out = out[:B, :out_features]
    return out


# ----------------------------------------------------------------------------
# Driver
# ----------------------------------------------------------------------------
if __name__ == "__main__":
    key = jax.random.PRNGKey(0)
    k_x, k_w = jax.random.split(key)

    B, F_in, F_out = 8, 32, 32                 # small shapes
    x = jax.random.normal(k_x, (B, F_in), dtype=jnp.float32)
    params, w_ref, b_ref = layer_init(k_w, F_out, F_in, bias_const=0.5)

    linear = jax.jit(linear_forward, static_argnames=("out_features",))
    y = linear(x, params["wt"], params["b"], out_features=F_out)
    y = jax.block_until_ready(y)

    # Reference check (bf16 MXU operands, f32 accumulation -> loose tolerance).
    y_ref = x @ w_ref.T + b_ref
    np.testing.assert_allclose(np.asarray(y), np.asarray(y_ref), rtol=2e-2, atol=2e-2)

    print("KERNEL_OK")
</pallas_src>

<mosaic_0001>
module attributes {stable_mosaic.version = 11 : i64} {
  func.func @_linear_kernel_single(%arg0: i32, %arg1: i32, %arg2: memref<16x128xbf16, #tpu.memory_space<vmem>>, %arg3: memref<128x128xbf16, #tpu.memory_space<vmem>>, %arg4: memref<1x128xf32, #tpu.memory_space<vmem>>, %arg5: memref<16x128xf32, #tpu.memory_space<vmem>>) attributes {dimension_semantics = [#tpu.dimension_semantics<parallel>, #tpu.dimension_semantics<parallel>], iteration_bounds = array<i64: 1, 1>, scalar_prefetch = 0 : i64, scratch_operands = 0 : i64, tpu.core_type = #tpu.core_type<tc>, window_params = [{transform_indices = @transform_0, window_bounds = array<i64: 16, 128>}, {transform_indices = @transform_1, window_bounds = array<i64: 128, 128>}, {transform_indices = @transform_2, window_bounds = array<i64: 1, 128>}, {transform_indices = @transform_3, window_bounds = array<i64: 16, 128>}]} {
    %c0 = arith.constant 0 : index
    %c0_0 = arith.constant 0 : index
    %0 = vector.load %arg2[%c0, %c0_0] : memref<16x128xbf16, #tpu.memory_space<vmem>>, vector<16x128xbf16>
    %c0_1 = arith.constant 0 : index
    %c0_2 = arith.constant 0 : index
    %1 = vector.load %arg3[%c0_1, %c0_2] : memref<128x128xbf16, #tpu.memory_space<vmem>>, vector<128x128xbf16>
    %cst = arith.constant dense<0.000000e+00> : vector<16x128xf32>
    %2 = tpu.matmul %0, %1, %cst {dimension_numbers = #tpu.dot_dimension_numbers<[1], [0], [0], [1], [0, 0, 1, 1], [], []>} : vector<16x128xbf16>, vector<128x128xbf16>, vector<16x128xf32> -> vector<16x128xf32>
    %c0_3 = arith.constant 0 : index
    %c0_4 = arith.constant 0 : index
    %3 = vector.load %arg4[%c0_3, %c0_4] : memref<1x128xf32, #tpu.memory_space<vmem>>, vector<1x128xf32>
    %4 = vector.broadcast %3 : vector<1x128xf32> to vector<16x128xf32>
    %5 = arith.addf %2, %4 : vector<16x128xf32>
    %c0_5 = arith.constant 0 : index
    %c0_6 = arith.constant 0 : index
    %6 = vector.load %arg5[%c0_5, %c0_6] : memref<16x128xf32, #tpu.memory_space<vmem>>, vector<16x128xf32>
    tpu.vector_store %arg5[%c0_5, %c0_6], %5 {strides = array<i32>} : memref<16x128xf32, #tpu.memory_space<vmem>>, vector<16x128xf32>,
    return
  }
  func.func @transform_0(%arg0: i32, %arg1: i32) -> (i32, i32) {
    %c0_i32 = arith.constant 0 : i32
    %c0_i32_0 = arith.constant 0 : i32
    return %arg0, %c0_i32 : i32, i32
  }
  func.func @transform_1(%arg0: i32, %arg1: i32) -> (i32, i32) {
    %c0_i32 = arith.constant 0 : i32
    %c0_i32_0 = arith.constant 0 : i32
    return %c0_i32, %arg1 : i32, i32
  }
  func.func @transform_2(%arg0: i32, %arg1: i32) -> (i32, i32) {
    %c0_i32 = arith.constant 0 : i32
    %c0_i32_0 = arith.constant 0 : i32
    return %c0_i32, %arg1 : i32, i32
  }
  func.func @transform_3(%arg0: i32, %arg1: i32) -> (i32, i32) {
    %c0_i32 = arith.constant 0 : i32
    return %arg0, %arg1 : i32, i32
  }
}

</mosaic_0001>

<bundles_post_ra>
// kernel: linear_forward.1
= control target key start
LH: loop header
LB: loop body
LE: loop exit
PB: predicated region body
PF: predicated region fallthrough
CT: control target
= control target key end

     0   :  { %8 = vsyncpa [#allocation3], 0  ;;  %s233_s12 = smov [#allocation2]   ;;  %s282_s0 = inlined_call_operand.vmem [shape: bf16[16,128], index: 0, kind: input, shape index: {}]   ;;  %s283_s1 = inlined_call_operand.hbm [shape: bf16[128,128], index: 1, kind: input, shape index: {}]   ;;  %s284_s2 = inlined_call_operand.vmem [shape: f32[1,128], index: 2, kind: input, shape index: {}]   ;;  %s285_s3 = inlined_call_operand.vmem [shape: f32[16,128], index: 3, kind: output, shape index: {}]  }
   0x1   :  { %s16_s13 = sshll.u32 %s233_s12, 4  ;;  %s209_s16 = scalar_lea.hbm %s283_s1, 1024  ;;  %s17_s13 = int_to_ptr.vmem [resolvable:$true] %s16_s13 }
   0x2   :  { %p210_p0 = scmp.ne.s32.totalorder %s283_s1, %s209_s16  ;;  %p213_p1 = scmp.lt.u32.totalorder %s209_s16, %s283_s1 }
   0x4   :  { %p215_p2 = pnand %p213_p1, %p210_p0 }
   0x6   :  { %218 = shalt.err (!%p215_p2)
}
   0x7   :  { %s219_s21 = scalar_lea.vmem %s17_s13, 1024  ;;  %p224_p4 = scmp.lt.s32.totalorder %s17_s13, %s17_s13 }
   0x8   :  { %p220_p3 = scmp.ne.s32.totalorder %s17_s13, %s219_s21  ;;  %p225_p5 = scmp.lt.s32.totalorder %s219_s21, %s219_s21 }
   0xa   :  { %p226_p6 = por %p225_p5, %p224_p4 }
   0xc   :  { %p227_p7 = pnand %p226_p6, %p220_p3 }
   0xe   :  { %230 = shalt.err (!%p227_p7)
}
   0xf   :  { %s234_s22 = smov 64   ;;  %s235_s23 = smov 4  }
  0x10   :  { %22 = dma.hbm_to_vmem [thread:$0]  %s283_s1, 1024, %s17_s13, [#allocation3], %s234_s22, %s234_s22, %s235_s23  }
  0x11   :  { %231 = dma.done.wait [#allocation3], 1024  }
  0x12   :  { %232 = vsyncadd [#allocation3], 4294966272  ;;  %v236_v0 = vmov 0.0   ;;  %vm237_vm0 = vmmov 0   ;;  %v200_v1 = vld [vmem:[#allocation2] sm:$0xff]   ;;  %v201_v2 = vld [vmem:[#allocation2 + $0x8] sm:$0xff]  }
  0x13   :  { %175 = vmatprep.subr.bf16.mxu0 %v236_v0  ;;  %191 = vmatprep.mubr.msk.bf16.mxu0 %vm237_vm0, %v236_v0  ;;  %v202_v3 = vld [vmem:[#allocation2 + $0x10] sm:$0xff]   ;;  %v203_v4 = vld [vmem:[#allocation2 + $0x18] sm:$0xff]   ;;  %v204_v5 = vld [vmem:[#allocation2 + $0x20] sm:$0xff]  }
  0x14   :  { %176 = vmatpush3.bf16.msra.mxu0 %v200_v1  ;;  %v205_v6 = vld [vmem:[#allocation2 + $0x28] sm:$0xff]   ;;  %v206_v7 = vld [vmem:[#allocation2 + $0x30] sm:$0xff]   ;;  %v207_v8 = vld [vmem:[#allocation2 + $0x38] sm:$0xff]  }
  0x15   :  { %177 = vmatprep.subr.bf16.mxu0 %v236_v0  ;;  %v208_v9 = vld [vmem:[%s282_s0] sm:$0xff]  }
  0x16   :  { %v156_v10 = vld [vmem:[%s284_s2] ss:$0 sm:$0xff] }
  0x18   :  { %178 = vmatpush3.bf16.msra.mxu0 %v201_v2 }
  0x19   :  { %179 = vmatprep.subr.bf16.mxu0 %v236_v0 }
  0x1c   :  { %180 = vmatpush3.bf16.msra.mxu0 %v202_v3 }
  0x1d   :  { %181 = vmatprep.subr.bf16.mxu0 %v236_v0 }
  0x20   :  { %182 = vmatpush3.bf16.msra.mxu0 %v203_v4 }
  0x21   :  { %183 = vmatprep.subr.bf16.mxu0 %v236_v0 }
  0x24   :  { %184 = vmatpush3.bf16.msra.mxu0 %v204_v5 }
  0x25   :  { %185 = vmatprep.subr.bf16.mxu0 %v236_v0 }
  0x28   :  { %186 = vmatpush3.bf16.msra.mxu0 %v205_v6 }
  0x29   :  { %187 = vmatprep.subr.bf16.mxu0 %v236_v0 }
  0x2c   :  { %188 = vmatpush3.bf16.msra.mxu0 %v206_v7 }
  0x2d   :  { %189 = vmatprep.subr.bf16.mxu0 %v236_v0 }
  0x30   :  { %190 = vmatpush3.bf16.msra.mxu0 %v207_v8 }
  0x33   :  { %192 = vmatmul.mubr.bf16.vlgmr.msra.gmra.mrb[0].mxu0 %v208_v9 }
 0x106   :  { %v142_v11 = vpop.f32.mrb[0].mxu0 }
 0x107   :  { %v143_v12 = vadd.f32 %v156_v10, %v142_v11  ;;  %v193_v13 = vpop.f32.mrb[1].mxu0 }
 0x108   :  { %v145_v14 = vpop.f32.mrb[2].mxu0 }
 0x109   :  { %149 = vst [vmem:[%s285_s3] sm:$0xff] %v143_v12  ;;  %v146_v15 = vadd.f32 %v156_v10, %v145_v14  ;;  %v194_v16 = vpop.f32.mrb[3].mxu0 }
 0x10b   :  { %150 = vst [vmem:[%s285_s3 + $0x8] sm:$0xff] %v146_v15 }
 0x10c   :  { %155 = vsyncpa [#allocation3], 1 }

</bundles_post_ra>
